<compile_context>
chip_gen: v7x
topology: tpu7x:2x2x1
jax: 0.10.0
libtpu: 0.0.40
codegen_flags: <defaults>
</compile_context>

<pallas_src>
import functools

import jax
import jax.numpy as jnp
from jax.experimental import pallas as pl
from jax.experimental.pallas import tpu as pltpu

INPUT_SIZE = 28 * 28   # 784
HIDDEN_SIZE = 100
NUM_CLASSES = 10

HIDDEN_PAD = 128       # 100 -> 128 lanes (lane-dense hidden activation)
CLASS_PAD = 128        # 10  -> 128 lanes (lane-dense, unmasked output stores)


def _cdiv(a, b):
    return -(-a // b)


def _round_up(n, m):
    return _cdiv(n, m) * m


def mlp_kernel(x_ref, w1_ref, b1_ref, w2_ref, b2_ref, o_ref):
    # x_ref : (tb, INPUT_SIZE)          f32 (cast to bf16 in-kernel)
    # w1_ref: (INPUT_SIZE, HIDDEN_PAD)  bf16
    # b1_ref: (1, HIDDEN_PAD)           f32
    # w2_ref: (HIDDEN_PAD, CLASS_PAD)   bf16
    # b2_ref: (1, CLASS_PAD)            f32
    # o_ref : (tb, CLASS_PAD)           bf16 (or f32 via out_dtype)
    x = x_ref[...].astype(w1_ref.dtype)            # VPU cast on the tile, no extra HBM pass
    h = jnp.dot(x, w1_ref[...], preferred_element_type=jnp.float32)
    h = jnp.maximum(h + b1_ref[...], 0.0)          # bias + ReLU in f32
    h = h.astype(w2_ref.dtype)                     # bf16 second matmul (v5e: no f32 MXU path)
    out = jnp.dot(h, w2_ref[...], preferred_element_type=jnp.float32)
    o_ref[...] = (out + b2_ref[...]).astype(o_ref.dtype)


def prepare_params(w1, b1, w2, b2, compute_dtype=jnp.bfloat16):
    """One-time weight prep: transpose to (in, out), zero-pad to 128 lanes, cast.

    PyTorch layout in: w1 (HIDDEN, INPUT), b1 (HIDDEN,),
                       w2 (CLASSES, HIDDEN), b2 (CLASSES,).
    Zero padding is exact: ReLU(0 + 0) = 0 and zero rows/cols of w2/b2
    contribute nothing to the real logits.
    """
    w1_t = jnp.pad(w1.T, ((0, 0), (0, HIDDEN_PAD - HIDDEN_SIZE)))
    b1_p = jnp.pad(b1, (0, HIDDEN_PAD - HIDDEN_SIZE)).reshape(1, HIDDEN_PAD)
    w2_t = jnp.pad(w2.T, ((0, HIDDEN_PAD - HIDDEN_SIZE),
                          (0, CLASS_PAD - NUM_CLASSES)))
    b2_p = jnp.pad(b2, (0, CLASS_PAD - NUM_CLASSES)).reshape(1, CLASS_PAD)
    return (w1_t.astype(compute_dtype),     # big matmul operand -> bf16
            b1_p.astype(jnp.float32),       # epilogue stays f32
            w2_t.astype(compute_dtype),     # second matmul also bf16 (f32 accumulation)
            b2_p.astype(jnp.float32))


@functools.partial(jax.jit, static_argnames=("tb", "out_dtype"))
def multi_cls_neural_net(x, params, *, tb=1024, out_dtype=jnp.bfloat16):
    """Forward pass. x: (B, INPUT_SIZE) f32 (or bf16). Returns (B, NUM_CLASSES)."""
    w1_t, b1_p, w2_t, b2_p = params
    B, in_dim = x.shape
    assert in_dim == INPUT_SIZE

    # Tile choice: rows are a multiple of 128 (full MXU M-dim, unmasked stores),
    # capped at tb for VMEM, and capped at round_up(B/2, 128) so any B > 128
    # gives >= 2 grid steps (v7x megacore sharding of the "parallel" axis).
    # No batch padding: Pallas clips the ragged last block on read/writeback.
    tb_eff = min(tb, max(128, _round_up(_cdiv(B, 2), 128)))
    grid = (_cdiv(B, tb_eff),)

    out = pl.pallas_call(
        mlp_kernel,
        out_shape=jax.ShapeDtypeStruct((B, CLASS_PAD), out_dtype),
        grid_spec=pltpu.PrefetchScalarGridSpec(
            num_scalar_prefetch=0,
            grid=grid,
            in_specs=[
                pl.BlockSpec((tb_eff, INPUT_SIZE), lambda i: (i, 0)),
                # Constant index_maps: weight/bias blocks fetched once, reused.
                pl.BlockSpec((INPUT_SIZE, HIDDEN_PAD), lambda i: (0, 0)),
                pl.BlockSpec((1, HIDDEN_PAD), lambda i: (0, 0)),
                pl.BlockSpec((HIDDEN_PAD, CLASS_PAD), lambda i: (0, 0)),
                pl.BlockSpec((1, CLASS_PAD), lambda i: (0, 0)),
            ],
            out_specs=pl.BlockSpec((tb_eff, CLASS_PAD), lambda i: (i, 0)),
        ),
        compiler_params=pltpu.CompilerParams(
            dimension_semantics=("parallel",),  # lets v7x shard tiles over 2 TCs
        ),
    )(x, w1_t, b1_p, w2_t, b2_p)

    return out[:, :NUM_CLASSES]


def init_params(key):
    """PyTorch nn.Linear default init: U[-1/sqrt(fan_in), 1/sqrt(fan_in)]."""
    k1, k2, k3, k4 = jax.random.split(key, 4)
    bound1 = 1.0 / jnp.sqrt(INPUT_SIZE)
    bound2 = 1.0 / jnp.sqrt(HIDDEN_SIZE)
    # PyTorch weight layout: (out_features, in_features)
    w1 = jax.random.uniform(k1, (HIDDEN_SIZE, INPUT_SIZE), jnp.float32, -bound1, bound1)
    b1 = jax.random.uniform(k2, (HIDDEN_SIZE,), jnp.float32, -bound1, bound1)
    w2 = jax.random.uniform(k3, (NUM_CLASSES, HIDDEN_SIZE), jnp.float32, -bound2, bound2)
    b2 = jax.random.uniform(k4, (NUM_CLASSES,), jnp.float32, -bound2, bound2)
    return w1, b1, w2, b2


def reference_forward(x, w1, b1, w2, b2, compute_dtype=jnp.bfloat16):
    """Reference mirroring the kernel's precision chain (bf16 operands, f32 acc,
    bf16 output).  Semantics match the PyTorch module up to bf16 rounding."""
    h = jnp.dot(x.astype(compute_dtype), w1.T.astype(compute_dtype),
                preferred_element_type=jnp.float32) + b1
    h = jnp.maximum(h, 0.0).astype(compute_dtype)
    out = jnp.dot(h, w2.T.astype(compute_dtype),
                  preferred_element_type=jnp.float32) + b2
    return out.astype(compute_dtype)


if __name__ == "__main__":
    key = jax.random.PRNGKey(0)
    kx, kp = jax.random.split(key)

    B = 8  # small demo batch; exercises the ragged (partial-block) path
    x = jax.random.normal(kx, (B, INPUT_SIZE), jnp.float32)
    w1, b1, w2, b2 = init_params(kp)

    params = prepare_params(w1, b1, w2, b2)   # one-time transpose / pad / cast
    out = multi_cls_neural_net(x, params)
    out = jax.block_until_ready(out)

    assert out.shape == (B, NUM_CLASSES)
    ref = reference_forward(x, w1, b1, w2, b2)
    assert jnp.allclose(out.astype(jnp.float32), ref.astype(jnp.float32),
                        atol=1e-2, rtol=1e-2), "mismatch vs reference"

    print("KERNEL_OK")
</pallas_src>

<mosaic_0001>
module attributes {stable_mosaic.version = 11 : i64} {
  func.func @mlp_kernel(%arg0: i32, %arg1: memref<128x784xf32, #tpu.memory_space<vmem>>, %arg2: memref<784x128xbf16, #tpu.memory_space<vmem>>, %arg3: memref<1x128xf32, #tpu.memory_space<vmem>>, %arg4: memref<128x128xbf16, #tpu.memory_space<vmem>>, %arg5: memref<1x128xf32, #tpu.memory_space<vmem>>, %arg6: memref<128x128xbf16, #tpu.memory_space<vmem>>) attributes {dimension_semantics = [#tpu.dimension_semantics<parallel>], iteration_bounds = array<i64: 1>, scalar_prefetch = 0 : i64, scratch_operands = 0 : i64, tpu.core_type = #tpu.core_type<tc>, window_params = [{transform_indices = @transform_0, window_bounds = array<i64: 128, 784>}, {pipeline_mode = #tpu.pipeline_mode<synchronous>, transform_indices = @transform_1, window_bounds = array<i64: 784, 128>}, {pipeline_mode = #tpu.pipeline_mode<synchronous>, transform_indices = @transform_2, window_bounds = array<i64: 1, 128>}, {pipeline_mode = #tpu.pipeline_mode<synchronous>, transform_indices = @transform_3, window_bounds = array<i64: 128, 128>}, {pipeline_mode = #tpu.pipeline_mode<synchronous>, transform_indices = @transform_4, window_bounds = array<i64: 1, 128>}, {transform_indices = @transform_5, window_bounds = array<i64: 128, 128>}]} {
    %c0 = arith.constant 0 : index
    %c0_0 = arith.constant 0 : index
    %0 = vector.load %arg1[%c0, %c0_0] : memref<128x784xf32, #tpu.memory_space<vmem>>, vector<128x784xf32>
    %1 = arith.truncf %0 : vector<128x784xf32> to vector<128x784xbf16>
    %c0_1 = arith.constant 0 : index
    %c0_2 = arith.constant 0 : index
    %2 = vector.load %arg2[%c0_1, %c0_2] : memref<784x128xbf16, #tpu.memory_space<vmem>>, vector<784x128xbf16>
    %cst = arith.constant dense<0.000000e+00> : vector<128x128xf32>
    %3 = tpu.matmul %1, %2, %cst {dimension_numbers = #tpu.dot_dimension_numbers<[1], [0], [0], [1], [0, 0, 1, 1], [], []>} : vector<128x784xbf16>, vector<784x128xbf16>, vector<128x128xf32> -> vector<128x128xf32>
    %c0_3 = arith.constant 0 : index
    %c0_4 = arith.constant 0 : index
    %4 = vector.load %arg3[%c0_3, %c0_4] : memref<1x128xf32, #tpu.memory_space<vmem>>, vector<1x128xf32>
    %5 = vector.broadcast %4 : vector<1x128xf32> to vector<128x128xf32>
    %6 = arith.addf %3, %5 : vector<128x128xf32>
    %cst_5 = arith.constant 0.000000e+00 : f32
    %7 = vector.broadcast %cst_5 : f32 to vector<128x128xf32>
    %8 = arith.maximumf %6, %7 : vector<128x128xf32>
    %9 = arith.truncf %8 : vector<128x128xf32> to vector<128x128xbf16>
    %c0_6 = arith.constant 0 : index
    %c0_7 = arith.constant 0 : index
    %10 = vector.load %arg4[%c0_6, %c0_7] : memref<128x128xbf16, #tpu.memory_space<vmem>>, vector<128x128xbf16>
    %cst_8 = arith.constant dense<0.000000e+00> : vector<128x128xf32>
    %11 = tpu.matmul %9, %10, %cst_8 {dimension_numbers = #tpu.dot_dimension_numbers<[1], [0], [0], [1], [0, 0, 1, 1], [], []>} : vector<128x128xbf16>, vector<128x128xbf16>, vector<128x128xf32> -> vector<128x128xf32>
    %c0_9 = arith.constant 0 : index
    %c0_10 = arith.constant 0 : index
    %12 = vector.load %arg5[%c0_9, %c0_10] : memref<1x128xf32, #tpu.memory_space<vmem>>, vector<1x128xf32>
    %13 = vector.broadcast %12 : vector<1x128xf32> to vector<128x128xf32>
    %14 = arith.addf %11, %13 : vector<128x128xf32>
    %15 = arith.truncf %14 : vector<128x128xf32> to vector<128x128xbf16>
    %c0_11 = arith.constant 0 : index
    %c0_12 = arith.constant 0 : index
    %16 = vector.load %arg6[%c0_11, %c0_12] : memref<128x128xbf16, #tpu.memory_space<vmem>>, vector<128x128xbf16>
    tpu.vector_store %arg6[%c0_11, %c0_12], %15 {strides = array<i32>} : memref<128x128xbf16, #tpu.memory_space<vmem>>, vector<128x128xbf16>,
    return
  }
  func.func @transform_0(%arg0: i32) -> (i32, i32) {
    %c0_i32 = arith.constant 0 : i32
    %c0_i32_0 = arith.constant 0 : i32
    return %arg0, %c0_i32 : i32, i32
  }
  func.func @transform_1(%arg0: i32) -> (i32, i32) {
    %c0_i32 = arith.constant 0 : i32
    %c0_i32_0 = arith.constant 0 : i32
    %c0_i32_1 = arith.constant 0 : i32
    return %c0_i32, %c0_i32_0 : i32, i32
  }
  func.func @transform_2(%arg0: i32) -> (i32, i32) {
    %c0_i32 = arith.constant 0 : i32
    %c0_i32_0 = arith.constant 0 : i32
    %c0_i32_1 = arith.constant 0 : i32
    return %c0_i32, %c0_i32_0 : i32, i32
  }
  func.func @transform_3(%arg0: i32) -> (i32, i32) {
    %c0_i32 = arith.constant 0 : i32
    %c0_i32_0 = arith.constant 0 : i32
    %c0_i32_1 = arith.constant 0 : i32
    return %c0_i32, %c0_i32_0 : i32, i32
  }
  func.func @transform_4(%arg0: i32) -> (i32, i32) {
    %c0_i32 = arith.constant 0 : i32
    %c0_i32_0 = arith.constant 0 : i32
    %c0_i32_1 = arith.constant 0 : i32
    return %c0_i32, %c0_i32_0 : i32, i32
  }
  func.func @transform_5(%arg0: i32) -> (i32, i32) {
    %c0_i32 = arith.constant 0 : i32
    %c0_i32_0 = arith.constant 0 : i32
    return %arg0, %c0_i32 : i32, i32
  }
}

</mosaic_0001>

<bundles_post_ra>
// kernel: multi_cls_neural_net.1
= control target key start
LH: loop header
LB: loop body
LE: loop exit
PB: predicated region body
PF: predicated region fallthrough
CT: control target
= control target key end

     0   :  { %10 = vsyncpa [#allocation3], 0  ;;  %s2083_s0 = inlined_call_operand.hbm [shape: f32[8,784], index: 0, kind: input, shape index: {}]   ;;  %s2084_s1 = inlined_call_operand.hbm [shape: bf16[784,128], index: 1, kind: input, shape index: {}]   ;;  %s2085_s2 = inlined_call_operand.vmem [shape: f32[1,128], index: 2, kind: input, shape index: {}]   ;;  %s2086_s3 = inlined_call_operand.hbm [shape: bf16[128,128], index: 3, kind: input, shape index: {}]   ;;  %s2087_s4 = inlined_call_operand.vmem [shape: f32[1,128], index: 4, kind: input, shape index: {}]   ;;  %s2088_s5 = inlined_call_operand.hbm [shape: bf16[8,128], index: 5, kind: output, shape index: {}]  }
   0x1   :  { %11 = vsyncpa [#allocation6], 0 }
   0x2   :  { %12 = vsyncpa [#allocation4], 0 }
   0x3   :  { %17 = vsyncadd [#allocation3], 13440  ;;  %s1905_s18 = smov [#allocation5]   ;;  %s1811_s22 = scalar_lea.hbm %s2084_s1, 6272 }
   0x4   :  { %s30_s19 = sshll.u32 %s1905_s18, 4  ;;  %p1812_p0 = scmp.ne.s32.totalorder %s2084_s1, %s1811_s22  ;;  %s31_s19 = int_to_ptr.vmem [resolvable:$true] %s30_s19 }
   0x5   :  { %p1815_p1 = scmp.lt.u32.totalorder %s1811_s22, %s2084_s1 }
   0x7   :  { %p1817_p2 = pnand %p1815_p1, %p1812_p0 }
   0x9   :  { %1820 = shalt.err (!%p1817_p2)
}
   0xa   :  { %s1821_s27 = scalar_lea.vmem %s31_s19, 6272  ;;  %p1826_p4 = scmp.lt.s32.totalorder %s31_s19, %s31_s19 }
   0xb   :  { %p1822_p3 = scmp.ne.s32.totalorder %s31_s19, %s1821_s27  ;;  %p1827_p5 = scmp.lt.s32.totalorder %s1821_s27, %s1821_s27 }
   0xd   :  { %p1828_p6 = por %p1827_p5, %p1826_p4 }
   0xf   :  { %p1829_p7 = pnand %p1828_p6, %p1822_p3 }
  0x11   :  { %1832 = shalt.err (!%p1829_p7)
}
  0x12   :  { %s1906_s28 = smov 64   ;;  %s1907_s29 = smov 4  }
  0x13   :  { %36 = dma.hbm_to_vmem [thread:$0]  %s2084_s1, 6272, %s31_s19, [#allocation6], %s1906_s28, %s1906_s28, %s1907_s29  }
  0x14   :  { %s1908_s7 = smov [#allocation2]   ;;  %s1833_s11 = scalar_lea.hbm %s2083_s0, 896 }
  0x15   :  { %s18_s8 = sshll.u32 %s1908_s7, 4  ;;  %p1834_p8 = scmp.ne.s32.totalorder %s2083_s0, %s1833_s11  ;;  %s19_s8 = int_to_ptr.vmem [resolvable:$true] %s18_s8 }
  0x16   :  { %p1837_p9 = scmp.lt.u32.totalorder %s1833_s11, %s2083_s0 }
  0x18   :  { %p1839_p10 = pnand %p1837_p9, %p1834_p8 }
  0x1a   :  { %1842 = shalt.err (!%p1839_p10)
}
  0x1b   :  { %s1843_s16 = scalar_lea.vmem %s19_s8, 896  ;;  %s1847_s1 = scalar_lea.vmem %s19_s8, 14336 }
  0x1c   :  { %p1844_p11 = scmp.ne.s32.totalorder %s19_s8, %s1843_s16  ;;  %p1848_p12 = scmp.lt.s32.totalorder %s19_s8, %s19_s8 }
  0x1d   :  { %p1849_p13 = scmp.lt.s32.totalorder %s1847_s1, %s1843_s16 }
  0x1f   :  { %p1850_p0 = por %p1849_p13, %p1848_p12 }
  0x21   :  { %p1851_p1 = pnand %p1850_p0, %p1844_p11 }
  0x23   :  { %1854 = shalt.err (!%p1851_p1)
}
  0x24   :  { %s1909_s17 = smov 896   ;;  %s1910_s18 = smov 56  }
  0x25   :  { %24 = dma.hbm_to_vmem [thread:$0]  %s2083_s0, 896, %s19_s8, [#allocation3], %s1909_s17, %s1909_s17, %s1910_s18  }
  0x26   :  { %s1911_s21 = smov [#allocation7]   ;;  %s1855_s25 = scalar_lea.hbm %s2086_s3, 1024 }
  0x27   :  { %s44_s22 = sshll.u32 %s1911_s21, 4  ;;  %p1856_p2 = scmp.ne.s32.totalorder %s2086_s3, %s1855_s25  ;;  %s45_s22 = int_to_ptr.vmem [resolvable:$true] %s44_s22 }
  0x28   :  { %p1859_p3 = scmp.lt.u32.totalorder %s1855_s25, %s2086_s3 }
  0x2a   :  { %p1861_p4 = pnand %p1859_p3, %p1856_p2 }
  0x2c   :  { %1864 = shalt.err (!%p1861_p4)
}
  0x2d   :  { %s1865_s7 = scalar_lea.vmem %s45_s22, 1024  ;;  %p1870_p6 = scmp.lt.s32.totalorder %s45_s22, %s45_s22 }
  0x2e   :  { %p1866_p5 = scmp.ne.s32.totalorder %s45_s22, %s1865_s7  ;;  %p1871_p7 = scmp.lt.s32.totalorder %s1865_s7, %s1865_s7 }
  0x30   :  { %p1872_p8 = por %p1871_p7, %p1870_p6 }
  0x32   :  { %p1873_p9 = pnand %p1872_p8, %p1866_p5 }
  0x34   :  { %1876 = shalt.err (!%p1873_p9)
}
  0x35   :  { %50 = dma.hbm_to_vmem [thread:$0]  %s2086_s3, 1024, %s45_s22, [#allocation6], %s1906_s28, %s1906_s28, %s1907_s29  }
  0x36   :  { %1899 = dma.done.wait [#allocation3], 14336  }
  0x37   :  { %1900 = vsyncadd [#allocation3], 4294952960 }
  0x38   :  { %1901 = dma.done.wait [#allocation6], 7296  }
  0x39   :  { %1902 = vsyncadd [#allocation6], 4294960000  ;;  %v1754_v0 = vld [vmem:[#allocation5 + $0x40] sm:$0xff]   ;;  %v1758_v4 = vld [vmem:[#allocation5 + $0x48] sm:$0xff]   ;;  %vm630_vm0 = vcmask 130048  }
  0x3a   :  { %v1755_v1 = vld [vmem:[#allocation5] sm:$0xff]   ;;  %1479 = vmatprep.subr.bf16.mxu0 %v1754_v0  ;;  %v1759_v5 = vld [vmem:[#allocation5 + $0x8] sm:$0xff]   ;;  %v1762_v8 = vld [vmem:[#allocation5 + $0x50] sm:$0xff]  }
  0x3b   :  { %v1756_v2 = vld [vmem:[#allocation5 + $0xc0] sm:$0xff]   ;;  %1480 = vmatpush3.bf16.msra.mxu0 %v1755_v1  ;;  %v1760_v6 = vld [vmem:[#allocation5 + $0xc8] sm:$0xff]   ;;  %v1763_v9 = vld [vmem:[#allocation5 + $0x10] sm:$0xff]  }
  0x3c   :  { %v1757_v3 = vld [vmem:[#allocation5 + $0x80] sm:$0xff]   ;;  %1543 = vmatprep.subr.bf16.mxu1 %v1756_v2  ;;  %1481 = vmatprep.subr.bf16.mxu0 %v1758_v4  ;;  %v1761_v7 = vld [vmem:[#allocation5 + $0x88] sm:$0xff]   ;;  %v1764_v10 = vld [vmem:[#allocation5 + $0xd0] sm:$0xff]  }
  0x3d   :  { %1544 = vmatpush3.bf16.msra.mxu1 %v1757_v3  ;;  %v1765_v11 = vld [vmem:[#allocation5 + $0x90] sm:$0xff]   ;;  %v1766_v12 = vld [vmem:[#allocation5 + $0x58] sm:$0xff]   ;;  %v1770_v16 = vld [vmem:[#allocation5 + $0x60] sm:$0xff]  }
  0x3e   :  { %1545 = vmatprep.subr.bf16.mxu1 %v1760_v6  ;;  %v1767_v13 = vld [vmem:[#allocation5 + $0x18] sm:$0xff]   ;;  %v1771_v17 = vld [vmem:[#allocation5 + $0x20] sm:$0xff]   ;;  %v1774_v20 = vld [vmem:[#allocation5 + $0x68] sm:$0xff]  }
  0x3f   :  { %1482 = vmatpush3.bf16.msra.mxu0 %v1759_v5  ;;  %v1768_v14 = vld [vmem:[#allocation5 + $0xd8] sm:$0xff]   ;;  %v1772_v18 = vld [vmem:[#allocation5 + $0xe0] sm:$0xff]   ;;  %v1775_v21 = vld [vmem:[#allocation5 + $0x28] sm:$0xff]  }
  0x40   :  { %1483 = vmatprep.subr.bf16.mxu0 %v1762_v8  ;;  %v1769_v15 = vld [vmem:[#allocation5 + $0x98] sm:$0xff]   ;;  %v1773_v19 = vld [vmem:[#allocation5 + $0xa0] sm:$0xff]   ;;  %v1776_v22 = vld [vmem:[#allocation5 + $0xe8] sm:$0xff]  }
  0x41   :  { %1546 = vmatpush3.bf16.msra.mxu1 %v1761_v7  ;;  %v1777_v23 = vld [vmem:[#allocation5 + $0xa8] sm:$0xff]   ;;  %v1778_v24 = vld [vmem:[#allocation5 + $0x70] sm:$0xff]   ;;  %v1782_v28 = vld [vmem:[#allocation5 + $0x78] sm:$0xff]  }
  0x42   :  { %1547 = vmatprep.subr.bf16.mxu1 %v1764_v10  ;;  %v1779_v25 = vld [vmem:[#allocation5 + $0x30] sm:$0xff]   ;;  %v1783_v29 = vld [vmem:[#allocation5 + $0x38] sm:$0xff]   ;;  %v64_v31 = vld [vmem:[#allocation2 + $0x8] sm:$0xff] }
  0x43   :  { %1484 = vmatpush3.bf16.msra.mxu0 %v1763_v9  ;;  %v1780_v26 = vld [vmem:[#allocation5 + $0xf0] sm:$0xff]   ;;  %v1784_v30 = vld [vmem:[#allocation5 + $0xf8] sm:$0xff]   ;;  %v71_v32 = vld [vmem:[#allocation2 + $0x40] sm:$0xff] }
  0x44   :  { %1485 = vmatprep.subr.bf16.mxu0 %v1766_v12  ;;  %v1781_v27 = vld [vmem:[#allocation5 + $0xb0] sm:$0xff]   ;;  %v176_v33 = vpack.c.bf16 %v71_v32, %v64_v31  ;;  %v1785_v34 = vld [vmem:[#allocation5 + $0xb8] sm:$0xff]   ;;  %v63_v35 = vld [vmem:[#allocation2] sm:$0xff] }
  0x45   :  { %1548 = vmatpush3.bf16.msra.mxu1 %v1765_v11  ;;  %v70_v36 = vld [vmem:[#allocation2 + $0x38] sm:$0xff]  ;;  %v1786_v38 = vld [vmem:[#allocation5 + $0x140] sm:$0xff]   ;;  %v73_v40 = vld [vmem:[#allocation2 + $0x50] sm:$0xff] }
  0x46   :  { %1549 = vmatprep.subr.bf16.mxu1 %v1768_v14  ;;  %687 = vmatprep.mubr.bf16.mxu0 %v176_v33  ;;  %v175_v37 = vpack.c.bf16 %v70_v36, %v63_v35  ;;  %v66_v39 = vld [vmem:[#allocation2 + $0x18] sm:$0xff]  ;;  %v1787_v42 = vld [vmem:[#allocation5 + $0x100] sm:$0xff]   ;;  %v65_v43 = vld [vmem:[#allocation2 + $0x10] sm:$0xff] }
  0x47   :  { %1486 = vmatpush3.bf16.msra.mxu0 %v1767_v13  ;;  %v178_v41 = vpack.c.bf16 %v73_v40, %v66_v39  ;;  %v72_v44 = vld [vmem:[#allocation2 + $0x48] sm:$0xff]  ;;  %v78_v45 = vld [vmem:[#allocation2 + $0x78] sm:$0xff]  ;;  %v85_v47 = vld [vmem:[#allocation2 + $0xb0] sm:$0xff] }
  0x48   :  { %1487 = vmatprep.subr.bf16.mxu0 %v1770_v16  ;;  %v177_v46 = vpack.c.bf16 %v72_v44, %v65_v43  ;;  %v77_v48 = vld [vmem:[#allocation2 + $0x70] sm:$0xff]  ;;  %v84_v49 = vld [vmem:[#allocation2 + $0xa8] sm:$0xff]  ;;  %v183_v50 = vpack.c.bf16 %v85_v47, %v78_v45  ;;  %v87_v53 = vld [vmem:[#allocation2 + $0xc0] sm:$0xff] }
  0x49   :  { %1550 = vmatpush3.bf16.msra.mxu1 %v1769_v15  ;;  %784 = vmatprep.mubr.bf16.mxu1 %v178_v41  ;;  %v1788_v51 = vld [vmem:[#allocation5 + $0x148] sm:$0xff]   ;;  %v182_v54 = vpack.c.bf16 %v84_v49, %v77_v48  ;;  %v79_v57 = vld [vmem:[#allocation2 + $0x80] sm:$0xff]  ;;  %v86_v58 = vld [vmem:[#allocation2 + $0xb8] sm:$0xff] }
  0x4a   :  { %1551 = vmatprep.subr.bf16.mxu1 %v1772_v18  ;;  %v80_v52 = vld [vmem:[#allocation2 + $0x88] sm:$0xff]  ;;  %v99_v60 = vld [vmem:[#allocation2 + $0x120] sm:$0xff]  ;;  %v184_v62 = vpack.c.bf16 %v86_v58, %v79_v57  ;;  %v1790_v63 = vld [vmem:[#allocation5 + $0x150] sm:$0xff]  }
  0x4b   :  { %1488 = vmatpush3.bf16.msra.mxu0 %v1771_v17  ;;  %v185_v55 = vpack.c.bf16 %v87_v53, %v80_v52  ;;  %v1789_v56 = vld [vmem:[#allocation5 + $0x108] sm:$0xff]   ;;  %v94_v0 = vld [vmem:[#allocation2 + $0xf8] sm:$0xff]  ;;  %v101_v1 = vld [vmem:[#allocation2 + $0x130] sm:$0xff] }
  0x4c   :  { %1489 = vmatprep.subr.bf16.mxu0 %v1774_v20  ;;  %v92_v59 = vld [vmem:[#allocation2 + $0xe8] sm:$0xff]  ;;  %v91_v2 = vld [vmem:[#allocation2 + $0xe0] sm:$0xff]  ;;  %v98_v3 = vld [vmem:[#allocation2 + $0x118] sm:$0xff]  ;;  %v192_v4 = vpack.c.bf16 %v101_v1, %v94_v0 }
  0x4d   :  { %1552 = vmatpush3.bf16.msra.mxu1 %v1773_v19  ;;  %v190_v61 = vpack.c.bf16 %v99_v60, %v92_v59  ;;  %v1791_v5 = vld [vmem:[#allocation5 + $0x110] sm:$0xff]   ;;  %v106_v7 = vld [vmem:[#allocation2 + $0x158] sm:$0xff]  ;;  %v100_v9 = vld [vmem:[#allocation2 + $0x128] sm:$0xff]  ;;  %v189_v10 = vpack.c.bf16 %v98_v3, %v91_v2 }
  0x4e   :  { %1553 = vmatprep.subr.bf16.mxu1 %v1776_v22  ;;  %v93_v6 = vld [vmem:[#allocation2 + $0xf0] sm:$0xff]  ;;  %v1792_v11 = vld [vmem:[#allocation5 + $0x158] sm:$0xff]   ;;  %v108_v12 = vld [vmem:[#allocation2 + $0x168] sm:$0xff] }
  0x4f   :  { %1490 = vmatpush3.bf16.msra.mxu0 %v1775_v21  ;;  %v113_v8 = vld [vmem:[#allocation2 + $0x190] sm:$0xff]  ;;  %v115_v13 = vld [vmem:[#allocation2 + $0x1a0] sm:$0xff]  ;;  %v1793_v15 = vld [vmem:[#allocation5 + $0x118] sm:$0xff]   ;;  %v191_v16 = vpack.c.bf16 %v100_v9, %v93_v6 }
  0x50   :  { %1491 = vmatprep.subr.bf16.mxu0 %v1778_v24  ;;  %v197_v14 = vpack.c.bf16 %v113_v8, %v106_v7  ;;  %v105_v17 = vld [vmem:[#allocation2 + $0x150] sm:$0xff]  ;;  %v199_v18 = vpack.c.bf16 %v115_v13, %v108_v12  ;;  %v1794_v19 = vld [vmem:[#allocation5 + $0x160] sm:$0xff]   ;;  %v112_v20 = vld [vmem:[#allocation2 + $0x188] sm:$0xff] }
  0x51   :  { %1554 = vmatpush3.bf16.msra.mxu1 %v1777_v23  ;;  %v120_v21 = vld [vmem:[#allocation2 + $0x1c8] sm:$0xff]  ;;  %v127_v22 = vld [vmem:[#allocation2 + $0x200] sm:$0xff]  ;;  %v196_v24 = vpack.c.bf16 %v112_v20, %v105_v17  ;;  %v126_v36 = vld [vmem:[#allocation2 + $0x1f8] sm:$0xff] }
  0x52   :  { %1555 = vmatprep.subr.bf16.mxu1 %v1780_v26  ;;  %v1795_v23 = vld [vmem:[#allocation5 + $0x120] sm:$0xff]   ;;  %v114_v26 = vld [vmem:[#allocation2 + $0x198] sm:$0xff]  ;;  %v1797_v31 = vld [vmem:[#allocation5 + $0x168] sm:$0xff]  }
  0x53   :  { %1492 = vmatpush3.bf16.msra.mxu0 %v1779_v25  ;;  %v107_v25 = vld [vmem:[#allocation2 + $0x160] sm:$0xff]  ;;  %v121_v39 = vld [vmem:[#allocation2 + $0x1d0] sm:$0xff]  ;;  %v128_v40 = vld [vmem:[#allocation2 + $0x208] sm:$0xff] }
  0x54   :  { %1493 = vmatprep.subr.bf16.mxu0 %v1782_v28  ;;  %v204_v28 = vpack.c.bf16 %v127_v22, %v120_v21  ;;  %v198_v32 = vpack.c.bf16 %v114_v26, %v107_v25  ;;  %v119_v35 = vld [vmem:[#allocation2 + $0x1c0] sm:$0xff]  ;;  %v1799_v41 = vld [vmem:[#allocation5 + $0x170] sm:$0xff]   ;;  %v136_v45 = vld [vmem:[#allocation2 + $0x248] sm:$0xff]  ;;  %v205_v47 = vpack.c.bf16 %v128_v40, %v121_v39 }
  0x55   :  { %1556 = vmatpush3.bf16.msra.mxu1 %v1781_v27  ;;  %v1796_v27 = vld [vmem:[#allocation5 + $0x180] sm:$0xff]   ;;  %v1800_v43 = vld [vmem:[#allocation5 + $0x130] sm:$0xff]   ;;  %v1801_v48 = vld [vmem:[#allocation5 + $0x178] sm:$0xff]  }
  0x56   :  { %1557 = vmatprep.subr.bf16.mxu1 %v1784_v30  ;;  %v129_v30 = vld [vmem:[#allocation2 + $0x210] sm:$0xff]  ;;  %v1802_v52 = vld [vmem:[#allocation5 + $0x138] sm:$0xff]   ;;  %v148_v53 = vld [vmem:[#allocation2 + $0x2a8] sm:$0xff] }
  0x57   :  { %1494 = vmatpush3.bf16.msra.mxu0 %v1783_v29  ;;  %v122_v29 = vld [vmem:[#allocation2 + $0x1d8] sm:$0xff]  ;;  %v133_v49 = vld [vmem:[#allocation2 + $0x230] sm:$0xff]  ;;  %v164_v7 = vld [vmem:[#allocation2 + $0x328] sm:$0xff] }
  0x58   :  { %1607 = vmatprep.subr.bf16.mxu0 %v1786_v38  ;;  %v206_v33 = vpack.c.bf16 %v129_v30, %v122_v29  ;;  %v141_v38 = vld [vmem:[#allocation2 + $0x270] sm:$0xff]  ;;  %v142_v57 = vld [vmem:[#allocation2 + $0x278] sm:$0xff]  ;;  %v171_v8 = vld [vmem:[#allocation2 + $0x360] sm:$0xff] }
  0x59   :  { %1558 = vmatpush3.bf16.msra.mxu1 %v1785_v34  ;;  %v1798_v34 = vld [vmem:[#allocation5 + $0x128] sm:$0xff]   ;;  %v150_v59 = vld [vmem:[#allocation2 + $0x2b8] sm:$0xff]  ;;  %v157_v60 = vld [vmem:[#allocation2 + $0x2f0] sm:$0xff] }
  0x5a   :  { %688 = vmatmul.mubr.bf16.vlgmr.msra.gmra.mrb[0].mxu0 %v175_v37  ;;  %1696 = vmatprep.subr.bf16.mxu1 %v1796_v27  ;;  %v134_v37 = vld [vmem:[#allocation2 + $0x238] sm:$0xff]  ;;  %v169_v2 = vld [vmem:[#allocation2 + $0x350] sm:$0xff]  ;;  %v168_v12 = vld [vmem:[#allocation2 + $0x348] sm:$0xff] }
  0x5b   :  { %1608 = vmatpush3.bf16.msra.mxu0 %v1787_v42  ;;  %695 = vmatprep.mubr.bf16.mxu0 %v183_v50  ;;  %v203_v42 = vpack.c.bf16 %v126_v36, %v119_v35  ;;  %v211_v44 = vpack.c.bf16 %v141_v38, %v134_v37  ;;  %v154_v0 = vld [vmem:[#allocation2 + $0x2d8] sm:$0xff]  ;;  %v68_v13 = vld [vmem:[#allocation2 + $0x28] sm:$0xff]  ;;  %v69_v17 = vld [vmem:[#allocation2 + $0x30] sm:$0xff] }
  0x5c   :  { %785 = vmatmul.mubr.bf16.vlgmr.msra.gmra.mrb[0].mxu1 %v177_v46  ;;  %1609 = vmatprep.subr.bf16.mxu0 %v1788_v51  ;;  %v143_v46 = vld [vmem:[#allocation2 + $0x280] sm:$0xff]  ;;  %v140_v51 = vld [vmem:[#allocation2 + $0x268] sm:$0xff]  ;;  %v162_v1 = vld [vmem:[#allocation2 + $0x318] sm:$0xff] }
  0x5d   :  { %792 = vmatprep.mubr.bf16.mxu1 %v185_v55  ;;  %1697 = vmatpush3.bf16.msra.mxu1 %v1796_v27  ;;  %v213_v50 = vpack.c.bf16 %v143_v46, %v136_v45  ;;  %v210_v55 = vpack.c.bf16 %v140_v51, %v133_v49  ;;  %v225_v6 = vpack.c.bf16 %v169_v2, %v162_v1  ;;  %v82_v25 = vld [vmem:[#allocation2 + $0x98] sm:$0xff]  ;;  %v89_v26 = vld [vmem:[#allocation2 + $0xd0] sm:$0xff]  ;;  %v88_v36 = vld [vmem:[#allocation2 + $0xc8] sm:$0xff] }
  0x5e   :  { %v90_v29 = vld [vmem:[#allocation2 + $0xd8] sm:$0xff]  ;;  %v187_v30 = vpack.c.bf16 %v89_v26, %v82_v25  ;;  %v81_v35 = vld [vmem:[#allocation2 + $0x90] sm:$0xff]  ;;  %v96_v37 = vld [vmem:[#allocation2 + $0x108] sm:$0xff] }
  0x5f   :  { %1610 = vmatpush3.bf16.msra.mxu0 %v1789_v56  ;;  %v135_v56 = vld [vmem:[#allocation2 + $0x240] sm:$0xff]  ;;  %v186_v39 = vpack.c.bf16 %v88_v36, %v81_v35  ;;  %v110_v49 = vld [vmem:[#allocation2 + $0x178] sm:$0xff]  ;;  %v1803_v25 = vld [vmem:[#allocation7] sm:$0xff]  }
  0x60   :  { %1611 = vmatprep.subr.bf16.mxu0 %v1790_v63  ;;  %v147_v63 = vld [vmem:[#allocation2 + $0x2a0] sm:$0xff]  ;;  %v174_v1 = vld [vmem:[#allocation2 + $0x378] sm:$0xff]  ;;  %1714 = vmatprep.subr.bf16.mxu1 %v1803_v25  ;;  %v1804_v26 = vld [vmem:[#allocation7 + $0x8] sm:$0xff]  }
  0x61   :  { %v217_v3 = vpack.c.bf16 %v154_v0, %v147_v63  ;;  %v103_v38 = vld [vmem:[#allocation2 + $0x140] sm:$0xff] }
  0x62   :  { %696 = vmatmul.mubr.bf16.gmra.mrb[4].mxu0 %v182_v54  ;;  %v155_v54 = vld [vmem:[#allocation2 + $0x2e0] sm:$0xff] }
  0x63   :  { %703 = vmatprep.mubr.bf16.mxu0 %v190_v61  ;;  %1612 = vmatpush3.bf16.msra.mxu0 %v1791_v5  ;;  %v218_v58 = vpack.c.bf16 %v155_v54, %v148_v53  ;;  %v212_v61 = vpack.c.bf16 %v142_v57, %v135_v56  ;;  %v156_v5 = vld [vmem:[#allocation2 + $0x2e8] sm:$0xff]  ;;  %v111_v40 = vld [vmem:[#allocation2 + $0x180] sm:$0xff]  ;;  %v146_v53 = vld [vmem:[#allocation2 + $0x298] sm:$0xff] }
  0x64   :  { %793 = vmatmul.mubr.bf16.gmra.mrb[4].mxu1 %v184_v62  ;;  %1613 = vmatprep.subr.bf16.mxu0 %v1792_v11  ;;  %v220_v62 = vpack.c.bf16 %v157_v60, %v150_v59  ;;  %v161_v11 = vld [vmem:[#allocation2 + $0x310] sm:$0xff]  ;;  %v160_v56 = vld [vmem:[#allocation2 + $0x308] sm:$0xff]  ;;  %v167_v0 = vld [vmem:[#allocation2 + $0x340] sm:$0xff] }
  0x65   :  { %800 = vmatprep.mubr.bf16.mxu1 %v192_v4  ;;  %v149_v4 = vld [vmem:[#allocation2 + $0x2b0] sm:$0xff]  ;;  %v116_v60 = vld [vmem:[#allocation2 + $0x1a8] sm:$0xff] }
  0x66   :  { %v219_v9 = vpack.c.bf16 %v156_v5, %v149_v4  ;;  %v109_v59 = vld [vmem:[#allocation2 + $0x170] sm:$0xff]  ;;  %v123_v4 = vld [vmem:[#allocation2 + $0x1e0] sm:$0xff]  ;;  %v130_v5 = vld [vmem:[#allocation2 + $0x218] sm:$0xff] }
  0x67   :  { %1614 = vmatpush3.bf16.msra.mxu0 %v1793_v15  ;;  %v170_v15 = vld [vmem:[#allocation2 + $0x358] sm:$0xff]  ;;  %v200_v63 = vpack.c.bf16 %v116_v60, %v109_v59 }
  0x68   :  { %1615 = vmatprep.subr.bf16.mxu0 %v1794_v19  ;;  %v224_v19 = vpack.c.bf16 %v168_v12, %v161_v11  ;;  %v144_v11 = vld [vmem:[#allocation2 + $0x288] sm:$0xff] }
  0x69   :  { %v152_v12 = vld [vmem:[#allocation2 + $0x2c8] sm:$0xff] }
  0x6a   :  { %704 = vmatmul.mubr.bf16.gmra.mrb[8].mxu0 %v189_v10  ;;  %v227_v10 = vpack.c.bf16 %v171_v8, %v164_v7  ;;  %v145_v7 = vld [vmem:[#allocation2 + $0x290] sm:$0xff]  ;;  %v207_v8 = vpack.c.bf16 %v130_v5, %v123_v4 }
  0x6b   :  { %711 = vmatprep.mubr.bf16.mxu0 %v197_v14  ;;  %1616 = vmatpush3.bf16.msra.mxu0 %v1795_v23  ;;  %v163_v14 = vld [vmem:[#allocation2 + $0x320] sm:$0xff] }
  0x6c   :  { %801 = vmatmul.mubr.bf16.gmra.mrb[8].mxu1 %v191_v16  ;;  %1617 = vmatprep.subr.bf16.mxu0 %v1797_v31  ;;  %v75_v16 = vld [vmem:[#allocation2 + $0x60] sm:$0xff]  ;;  %v226_v21 = vpack.c.bf16 %v170_v15, %v163_v14  ;;  %v97_v31 = vld [vmem:[#allocation2 + $0x110] sm:$0xff] }
  0x6d   :  { %808 = vmatprep.mubr.bf16.mxu1 %v199_v18  ;;  %v76_v18 = vld [vmem:[#allocation2 + $0x68] sm:$0xff]  ;;  %v180_v20 = vpack.c.bf16 %v75_v16, %v68_v13  ;;  %v67_v23 = vld [vmem:[#allocation2 + $0x20] sm:$0xff] }
  0x6e   :  { %v181_v22 = vpack.c.bf16 %v76_v18, %v69_v17  ;;  %v159_v13 = vld [vmem:[#allocation2 + $0x300] sm:$0xff]  ;;  %v158_v17 = vld [vmem:[#allocation2 + $0x2f8] sm:$0xff] }
  0x6f   :  { %1618 = vmatpush3.bf16.msra.mxu0 %v1798_v34  ;;  %v222_v15 = vpack.c.bf16 %v159_v13, %v152_v12  ;;  %v151_v16 = vld [vmem:[#allocation2 + $0x2c0] sm:$0xff]  ;;  %v166_v18 = vld [vmem:[#allocation2 + $0x338] sm:$0xff] }
  0x70   :  { %1619 = vmatprep.subr.bf16.mxu0 %v1799_v41  ;;  %v118_v41 = vld [vmem:[#allocation2 + $0x1b8] sm:$0xff] }
  0x71   :  { %v202_v45 = vpack.c.bf16 %v118_v41, %v111_v40 }
  0x72   :  { %712 = vmatmul.mubr.bf16.gmra.mrb[12].mxu0 %v196_v24  ;;  %v74_v24 = vld [vmem:[#allocation2 + $0x58] sm:$0xff] }
  0x73   :  { %719 = vmatprep.mubr.bf16.mxu0 %v204_v28  ;;  %1620 = vmatpush3.bf16.msra.mxu0 %v1800_v43  ;;  %v179_v27 = vpack.c.bf16 %v74_v24, %v67_v23  ;;  %v83_v28 = vld [vmem:[#allocation2 + $0xa0] sm:$0xff]  ;;  %v125_v43 = vld [vmem:[#allocation2 + $0x1f0] sm:$0xff]  ;;  %v172_v23 = vld [vmem:[#allocation2 + $0x368] sm:$0xff] }
  0x74   :  { %809 = vmatmul.mubr.bf16.gmra.mrb[12].mxu1 %v198_v32  ;;  %1621 = vmatprep.subr.bf16.mxu0 %v1801_v48  ;;  %v104_v32 = vld [vmem:[#allocation2 + $0x148] sm:$0xff]  ;;  %v102_v48 = vld [vmem:[#allocation2 + $0x138] sm:$0xff] }
  0x75   :  { %816 = vmatprep.mubr.bf16.mxu1 %v206_v33  ;;  %v188_v33 = vpack.c.bf16 %v90_v29, %v83_v28  ;;  %v195_v34 = vpack.c.bf16 %v104_v32, %v97_v31  ;;  %v1806_v28 = vld [vmem:[#allocation7 + $0x18] sm:$0xff]   ;;  %v1807_v29 = vld [vmem:[#allocation7 + $0x20] sm:$0xff]   ;;  %v1809_v31 = vld [vmem:[#allocation7 + $0x30] sm:$0xff]  }
  0x76   :  { %v1810_v32 = vld [vmem:[#allocation7 + $0x38] sm:$0xff]  }
  0x77   :  { %1622 = vmatpush3.bf16.msra.mxu0 %v1802_v52  ;;  %v139_v52 = vld [vmem:[#allocation2 + $0x260] sm:$0xff] }
  0x78   :  { %v216_v57 = vpack.c.bf16 %v146_v53, %v139_v52 }
  0x7a   :  { %720 = vmatmul.mubr.bf16.gmra.mrb[16].mxu0 %v203_v42  ;;  %v194_v42 = vpack.c.bf16 %v103_v38, %v96_v37 }
  0x7b   :  { %727 = vmatprep.mubr.bf16.mxu0 %v211_v44  ;;  %v132_v44 = vld [vmem:[#allocation2 + $0x228] sm:$0xff] }
  0x7c   :  { %817 = vmatmul.mubr.bf16.gmra.mrb[16].mxu1 %v205_v47  ;;  %v209_v46 = vpack.c.bf16 %v132_v44, %v125_v43  ;;  %v95_v47 = vld [vmem:[#allocation2 + $0x100] sm:$0xff] }
  0x7d   :  { %824 = vmatprep.mubr.bf16.mxu1 %v213_v50  ;;  %v117_v50 = vld [vmem:[#allocation2 + $0x1b0] sm:$0xff]  ;;  %v193_v51 = vpack.c.bf16 %v102_v48, %v95_v47 }
  0x7e   :  { %v201_v54 = vpack.c.bf16 %v117_v50, %v110_v49 }
  0x82   :  { %728 = vmatmul.mubr.bf16.gmra.mrb[20].mxu0 %v210_v55  ;;  %v153_v55 = vld [vmem:[#allocation2 + $0x2d0] sm:$0xff] }
  0x83   :  { %735 = vmatprep.mubr.bf16.mxu0 %v218_v58  ;;  %v223_v58 = vpack.c.bf16 %v160_v56, %v153_v55 }
  0x84   :  { %825 = vmatmul.mubr.bf16.gmra.mrb[20].mxu1 %v212_v61  ;;  %v124_v61 = vld [vmem:[#allocation2 + $0x1e8] sm:$0xff] }
  0x85   :  { %832 = vmatprep.mubr.bf16.mxu1 %v220_v62  ;;  %v131_v62 = vld [vmem:[#allocation2 + $0x220] sm:$0xff] }
  0x86   :  { %v208_v2 = vpack.c.bf16 %v131_v62, %v124_v61 }
  0x8a   :  { %736 = vmatmul.mubr.bf16.gmra.mrb[24].mxu0 %v217_v3  ;;  %v230_v3 = vpack.c.bf16 %v174_v1, %v167_v0 }
  0x8b   :  { %743 = vmatprep.mubr.bf16.mxu0 %v225_v6  ;;  %v138_v6 = vld [vmem:[#allocation2 + $0x258] sm:$0xff] }
  0x8c   :  { %833 = vmatmul.mubr.bf16.gmra.mrb[24].mxu1 %v219_v9  ;;  %v215_v9 = vpack.c.bf16 %v145_v7, %v138_v6 }
  0x8d   :  { %840 = vmatprep.mubr.bf16.mxu1 %v227_v10  ;;  %v137_v10 = vld [vmem:[#allocation2 + $0x250] sm:$0xff] }
  0x8e   :  { %v214_v14 = vpack.c.bf16 %v144_v11, %v137_v10 }
  0x92   :  { %744 = vmatmul.mubr.bf16.gmra.mrb[28].mxu0 %v224_v19  ;;  %v173_v19 = vld [vmem:[#allocation2 + $0x370] sm:$0xff] }
  0x93   :  { %881 = vmatprep.mubr.bf16.mxu0 %v180_v20  ;;  %v221_v20 = vpack.c.bf16 %v158_v17, %v151_v16 }
  0x94   :  { %841 = vmatmul.mubr.bf16.gmra.mrb[28].mxu1 %v226_v21  ;;  %v229_v21 = vpack.c.bf16 %v173_v19, %v166_v18 }
  0x95   :  { %1698 = vmatprep.mubr.msk.bf16.mxu1 %vm630_vm0, %v181_v22  ;;  %v165_v22 = vld [vmem:[#allocation2 + $0x330] sm:$0xff] }
  0x96   :  { %v228_v24 = vpack.c.bf16 %v172_v23, %v165_v22 }
  0x9a   :  { %882 = vmatmul.mubr.bf16.vlgmr.msra.gmra.mrb[32].mxu0 %v179_v27  ;;  %v1805_v27 = vld [vmem:[#allocation7 + $0x10] sm:$0xff]  }
  0x9b   :  { %889 = vmatprep.mubr.bf16.mxu0 %v187_v30  ;;  %v1808_v30 = vld [vmem:[#allocation7 + $0x28] sm:$0xff]  }
  0x9c   :  { %1699 = vmatmul.mubr.msk.bf16.vlgmr.msra.gmra.mrb[32].mxu1 %vm630_vm0, %v188_v33 }
  0x9d   :  { %1702 = vmatprep.mubr.msk.bf16.mxu1 %vm630_vm0, %v195_v34  ;;  %1715 = vmatpush3.bf16.msra.mxu1 %v1803_v25  ;;  %v1996_v34 = vld [vmem:[%s2085_s2] ss:$0 sm:$0xff] }
  0x9e   :  { %1716 = vmatprep.subr.bf16.mxu1 %v1804_v26 }
  0xa1   :  { %1717 = vmatpush3.bf16.msra.mxu1 %v1804_v26 }
  0xa2   :  { %890 = vmatmul.mubr.bf16.gmra.mrb[36].mxu0 %v186_v39  ;;  %1718 = vmatprep.subr.bf16.mxu1 %v1805_v27 }
  0xa3   :  { %897 = vmatprep.mubr.bf16.mxu0 %v194_v42 }
  0xa4   :  { %1703 = vmatmul.mubr.msk.bf16.gmra.mrb[36].mxu1 %vm630_vm0, %v202_v45 }
  0xa5   :  { %1706 = vmatprep.mubr.msk.bf16.mxu1 %vm630_vm0, %v209_v46  ;;  %1719 = vmatpush3.bf16.msra.mxu1 %v1805_v27 }
  0xa6   :  { %1720 = vmatprep.subr.bf16.mxu1 %v1806_v28 }
  0xa9   :  { %1721 = vmatpush3.bf16.msra.mxu1 %v1806_v28 }
  0xaa   :  { %898 = vmatmul.mubr.bf16.gmra.mrb[40].mxu0 %v193_v51  ;;  %1722 = vmatprep.subr.bf16.mxu1 %v1807_v29 }
  0xab   :  { %905 = vmatprep.mubr.bf16.mxu0 %v201_v54 }
  0xac   :  { %1707 = vmatmul.mubr.msk.bf16.gmra.mrb[40].mxu1 %vm630_vm0, %v216_v57 }
  0xad   :  { %1710 = vmatprep.mubr.msk.bf16.mxu1 %vm630_vm0, %v223_v58  ;;  %1723 = vmatpush3.bf16.msra.mxu1 %v1807_v29 }
  0xae   :  { %1724 = vmatprep.subr.bf16.mxu1 %v1808_v30 }
  0xb1   :  { %1725 = vmatpush3.bf16.msra.mxu1 %v1808_v30 }
  0xb2   :  { %906 = vmatmul.mubr.bf16.gmra.mrb[44].mxu0 %v200_v63  ;;  %1726 = vmatprep.subr.bf16.mxu1 %v1809_v31 }
  0xb3   :  { %913 = vmatprep.mubr.bf16.mxu0 %v208_v2 }
  0xb4   :  { %1711 = vmatmul.mubr.msk.bf16.gmra.mrb[44].mxu1 %vm630_vm0, %v230_v3 }
  0xb5   :  { %1727 = vmatpush3.bf16.msra.mxu1 %v1809_v31 }
  0xb6   :  { %1728 = vmatprep.subr.bf16.mxu1 %v1810_v32 }
  0xb9   :  { %1729 = vmatpush3.bf16.msra.mxu1 %v1810_v32 }
  0xba   :  { %914 = vmatmul.mubr.bf16.gmra.mrb[48].mxu0 %v207_v8 }
  0xbb   :  { %921 = vmatprep.mubr.bf16.mxu0 %v215_v9 }
  0xc2   :  { %922 = vmatmul.mubr.bf16.gmra.mrb[52].mxu0 %v214_v14 }
  0xc3   :  { %929 = vmatprep.mubr.bf16.mxu0 %v222_v15 }
  0xca   :  { %930 = vmatmul.mubr.bf16.gmra.mrb[56].mxu0 %v221_v20 }
  0xcb   :  { %937 = vmatprep.mubr.bf16.mxu0 %v229_v21 }
  0xd2   :  { %938 = vmatmul.mubr.bf16.gmra.mrb[60].mxu0 %v228_v24 }
 0x12d   :  { %v1495_v33 = vpop.f32.mrb[0].mxu0 }
 0x12e   :  { %v1496_v35 = vpop.f32.mrb[1].mxu0 }
 0x12f   :  { %v1497_v36 = vadd.f32 %v1496_v35, %v1495_v33  ;;  %v1498_v37 = vpop.f32.mrb[2].mxu0  ;;  %v1559_v38 = vpop.f32.mrb[0].mxu1 }
 0x130   :  { %v1499_v39 = vpop.f32.mrb[3].mxu0  ;;  %v1560_v42 = vpop.f32.mrb[1].mxu1 }
 0x131   :  { %v690_v40 = vadd.f32 %v1497_v36, %v1996_v34  ;;  %v1500_v41 = vadd.f32 %v1499_v39, %v1498_v37  ;;  %v1561_v43 = vadd.f32 %v1560_v42, %v1559_v38  ;;  %v1562_v44 = vpop.f32.mrb[2].mxu1 }
 0x132   :  { %v1563_v46 = vpop.f32.mrb[3].mxu1 }
 0x133   :  { %v693_v45 = vadd.f32 %v1500_v41, %v1996_v34  ;;  %v2000_v47 = vadd.f32 %v1561_v43, %v690_v40  ;;  %v1564_v48 = vadd.f32 %v1563_v46, %v1562_v44 }
 0x135   :  { %v1501_v49 = vpop.f32.mrb[4].mxu0  ;;  %v2002_v50 = vadd.f32 %v1564_v48, %v693_v45 }
 0x136   :  { %v1502_v51 = vpop.f32.mrb[5].mxu0 }
 0x137   :  { %v1503_v52 = vadd.f32 %v1502_v51, %v1501_v49  ;;  %v1504_v53 = vpop.f32.mrb[6].mxu0  ;;  %v1565_v54 = vpop.f32.mrb[4].mxu1 }
 0x138   :  { %v1505_v55 = vpop.f32.mrb[7].mxu0  ;;  %v1566_v58 = vpop.f32.mrb[5].mxu1 }
 0x139   :  { %v698_v56 = vadd.f32 %v1503_v52, %v1996_v34  ;;  %v1506_v57 = vadd.f32 %v1505_v55, %v1504_v53  ;;  %v1567_v59 = vadd.f32 %v1566_v58, %v1565_v54  ;;  %v1568_v60 = vpop.f32.mrb[6].mxu1 }
 0x13a   :  { %v1569_v62 = vpop.f32.mrb[7].mxu1 }
 0x13b   :  { %v701_v61 = vadd.f32 %v1506_v57, %v1996_v34  ;;  %v2006_v63 = vadd.f32 %v1567_v59, %v698_v56  ;;  %v1570_v0 = vadd.f32 %v1569_v62, %v1568_v60 }
 0x13d   :  { %v1507_v1 = vpop.f32.mrb[8].mxu0  ;;  %v2008_v2 = vadd.f32 %v1570_v0, %v701_v61 }
 0x13e   :  { %v1508_v3 = vpop.f32.mrb[9].mxu0 }
 0x13f   :  { %v1509_v4 = vadd.f32 %v1508_v3, %v1507_v1  ;;  %v1510_v5 = vpop.f32.mrb[10].mxu0  ;;  %v1571_v6 = vpop.f32.mrb[8].mxu1 }
 0x140   :  { %v1511_v7 = vpop.f32.mrb[11].mxu0  ;;  %v1572_v10 = vpop.f32.mrb[9].mxu1 }
 0x141   :  { %v706_v8 = vadd.f32 %v1509_v4, %v1996_v34  ;;  %v1512_v9 = vadd.f32 %v1511_v7, %v1510_v5  ;;  %v1573_v11 = vadd.f32 %v1572_v10, %v1571_v6  ;;  %v1574_v12 = vpop.f32.mrb[10].mxu1 }
 0x142   :  { %v1575_v14 = vpop.f32.mrb[11].mxu1 }
 0x143   :  { %v709_v13 = vadd.f32 %v1512_v9, %v1996_v34  ;;  %v2012_v15 = vadd.f32 %v1573_v11, %v706_v8  ;;  %v1576_v16 = vadd.f32 %v1575_v14, %v1574_v12 }
 0x145   :  { %v1513_v17 = vpop.f32.mrb[12].mxu0  ;;  %v2014_v18 = vadd.f32 %v1576_v16, %v709_v13 }
 0x146   :  { %v1514_v19 = vpop.f32.mrb[13].mxu0 }
 0x147   :  { %v1515_v20 = vadd.f32 %v1514_v19, %v1513_v17  ;;  %v1516_v21 = vpop.f32.mrb[14].mxu0  ;;  %v1577_v22 = vpop.f32.mrb[12].mxu1 }
 0x148   :  { %v1517_v23 = vpop.f32.mrb[15].mxu0  ;;  %v1578_v26 = vpop.f32.mrb[13].mxu1 }
 0x149   :  { %v714_v24 = vadd.f32 %v1515_v20, %v1996_v34  ;;  %v1518_v25 = vadd.f32 %v1517_v23, %v1516_v21  ;;  %v1579_v27 = vadd.f32 %v1578_v26, %v1577_v22  ;;  %v1580_v28 = vpop.f32.mrb[14].mxu1 }
 0x14a   :  { %v1581_v30 = vpop.f32.mrb[15].mxu1 }
 0x14b   :  { %v717_v29 = vadd.f32 %v1518_v25, %v1996_v34  ;;  %v2018_v31 = vadd.f32 %v1579_v27, %v714_v24  ;;  %v1582_v32 = vadd.f32 %v1581_v30, %v1580_v28 }
 0x14d   :  { %v1519_v33 = vpop.f32.mrb[16].mxu0  ;;  %v2020_v35 = vadd.f32 %v1582_v32, %v717_v29 }
 0x14e   :  { %v1520_v36 = vpop.f32.mrb[17].mxu0 }
 0x14f   :  { %v1521_v37 = vadd.f32 %v1520_v36, %v1519_v33  ;;  %v1522_v38 = vpop.f32.mrb[18].mxu0  ;;  %v1583_v39 = vpop.f32.mrb[16].mxu1 }
 0x150   :  { %v1523_v40 = vpop.f32.mrb[19].mxu0  ;;  %v1584_v43 = vpop.f32.mrb[17].mxu1 }
 0x151   :  { %v722_v41 = vadd.f32 %v1521_v37, %v1996_v34  ;;  %v1524_v42 = vadd.f32 %v1523_v40, %v1522_v38  ;;  %v1585_v44 = vadd.f32 %v1584_v43, %v1583_v39  ;;  %v1586_v45 = vpop.f32.mrb[18].mxu1 }
 0x152   :  { %v1587_v48 = vpop.f32.mrb[19].mxu1 }
 0x153   :  { %v725_v46 = vadd.f32 %v1524_v42, %v1996_v34  ;;  %v2024_v49 = vadd.f32 %v1585_v44, %v722_v41  ;;  %v1588_v51 = vadd.f32 %v1587_v48, %v1586_v45 }
 0x155   :  { %v1525_v52 = vpop.f32.mrb[20].mxu0  ;;  %v2026_v53 = vadd.f32 %v1588_v51, %v725_v46 }
 0x156   :  { %v1526_v54 = vpop.f32.mrb[21].mxu0 }
 0x157   :  { %v1527_v55 = vadd.f32 %v1526_v54, %v1525_v52  ;;  %v1528_v56 = vpop.f32.mrb[22].mxu0  ;;  %v1589_v57 = vpop.f32.mrb[20].mxu1 }
 0x158   :  { %v1529_v58 = vpop.f32.mrb[23].mxu0  ;;  %v1590_v61 = vpop.f32.mrb[21].mxu1 }
 0x159   :  { %v730_v59 = vadd.f32 %v1527_v55, %v1996_v34  ;;  %v1530_v60 = vadd.f32 %v1529_v58, %v1528_v56  ;;  %v1591_v62 = vadd.f32 %v1590_v61, %v1589_v57  ;;  %v1592_v0 = vpop.f32.mrb[22].mxu1 }
 0x15a   :  { %v1593_v3 = vpop.f32.mrb[23].mxu1 }
 0x15b   :  { %v733_v1 = vadd.f32 %v1530_v60, %v1996_v34  ;;  %v2030_v4 = vadd.f32 %v1591_v62, %v730_v59  ;;  %v1594_v5 = vadd.f32 %v1593_v3, %v1592_v0 }
 0x15d   :  { %v1531_v6 = vpop.f32.mrb[24].mxu0  ;;  %v2032_v7 = vadd.f32 %v1594_v5, %v733_v1 }
 0x15e   :  { %v1532_v8 = vpop.f32.mrb[25].mxu0 }
 0x15f   :  { %v1533_v9 = vadd.f32 %v1532_v8, %v1531_v6  ;;  %v1534_v10 = vpop.f32.mrb[26].mxu0  ;;  %v1595_v11 = vpop.f32.mrb[24].mxu1 }
 0x160   :  { %v1535_v12 = vpop.f32.mrb[27].mxu0  ;;  %v1596_v16 = vpop.f32.mrb[25].mxu1 }
 0x161   :  { %v738_v13 = vadd.f32 %v1533_v9, %v1996_v34  ;;  %v1536_v14 = vadd.f32 %v1535_v12, %v1534_v10  ;;  %v1597_v17 = vadd.f32 %v1596_v16, %v1595_v11  ;;  %v1598_v19 = vpop.f32.mrb[26].mxu1 }
 0x162   :  { %v1599_v21 = vpop.f32.mrb[27].mxu1 }
 0x163   :  { %v741_v20 = vadd.f32 %v1536_v14, %v1996_v34  ;;  %v2036_v22 = vadd.f32 %v1597_v17, %v738_v13  ;;  %v1600_v23 = vadd.f32 %v1599_v21, %v1598_v19 }
 0x165   :  { %v1537_v24 = vpop.f32.mrb[28].mxu0  ;;  %v2038_v25 = vadd.f32 %v1600_v23, %v741_v20 }
 0x166   :  { %v1538_v26 = vpop.f32.mrb[29].mxu0 }
 0x167   :  { %v1539_v27 = vadd.f32 %v1538_v26, %v1537_v24  ;;  %v1540_v28 = vpop.f32.mrb[30].mxu0  ;;  %v1601_v29 = vpop.f32.mrb[28].mxu1 }
 0x168   :  { %v1541_v30 = vpop.f32.mrb[31].mxu0  ;;  %v1602_v36 = vpop.f32.mrb[29].mxu1 }
 0x169   :  { %v746_v32 = vadd.f32 %v1539_v27, %v1996_v34  ;;  %v1542_v33 = vadd.f32 %v1541_v30, %v1540_v28  ;;  %v1603_v37 = vadd.f32 %v1602_v36, %v1601_v29  ;;  %v1604_v38 = vpop.f32.mrb[30].mxu1 }
 0x16a   :  { %v1605_v40 = vpop.f32.mrb[31].mxu1 }
 0x16b   :  { %v749_v39 = vadd.f32 %v1542_v33, %v1996_v34  ;;  %v2042_v41 = vadd.f32 %v1603_v37, %v746_v32  ;;  %v1606_v42 = vadd.f32 %v1605_v40, %v1604_v38 }
 0x16d   :  { %v1623_v43 = vpop.f32.mrb[32].mxu0  ;;  %v2044_v44 = vadd.f32 %v1606_v42, %v749_v39 }
 0x16e   :  { %v1624_v45 = vpop.f32.mrb[33].mxu0 }
 0x16f   :  { %v1625_v46 = vadd.f32 %v1624_v45, %v1623_v43  ;;  %v1626_v48 = vpop.f32.mrb[34].mxu0  ;;  %v1700_v52 = vpop.f32.mrb[32].mxu1 }
 0x170   :  { %v1627_v51 = vpop.f32.mrb[35].mxu0  ;;  %v980_v56 = vpop.f32.mrb[33].mxu1 }
 0x171   :  { %v1628_v54 = vadd.f32 %v1627_v51, %v1626_v48  ;;  %v884_v55 = vadd.f32 %v1625_v46, %v2000_v47  ;;  %v1701_v57 = vpop.f32.mrb[34].mxu1 }
 0x172   :  { %v983_v59 = vpop.f32.mrb[35].mxu1 }
 0x173   :  { %v981_v58 = vadd.f32 %v980_v56, %v884_v55  ;;  %v887_v34 = vadd.f32 %v1628_v54, %v2002_v50 }
 0x175   :  { %v984_v60 = vadd.f32 %v983_v59, %v887_v34  ;;  %v1629_v61 = vpop.f32.mrb[36].mxu0  ;;  %v1043_v0 = vmax.f32 %v981_v58, 0.0 }
 0x176   :  { %v1630_v62 = vpop.f32.mrb[37].mxu0 }
 0x177   :  { %v1044_v1 = vmax.f32 %v984_v60, 0.0  ;;  %v1631_v3 = vadd.f32 %v1630_v62, %v1629_v61  ;;  %v1632_v5 = vpop.f32.mrb[38].mxu0  ;;  %v1704_v8 = vpop.f32.mrb[36].mxu1 }
 0x178   :  { %v1633_v6 = vpop.f32.mrb[39].mxu0  ;;  %v996_v47 = vpop.f32.mrb[37].mxu1 }
 0x179   :  { %v1059_v9 = vpack.c.bf16 %v1044_v1, %v1043_v0  ;;  %v892_v10 = vadd.f32 %v1631_v3, %v2006_v63  ;;  %v1634_v11 = vadd.f32 %v1633_v6, %v1632_v5  ;;  %v1705_v12 = vpop.f32.mrb[38].mxu1 }
 0x17a   :  { %v999_v50 = vpop.f32.mrb[39].mxu1 }
 0x17b   :  { %v989_v13 = vadd.f32 %v1700_v52, %v892_v10  ;;  %v895_v14 = vadd.f32 %v1634_v11, %v2008_v2  ;;  %1730 = vmatprep.mubr.bf16.mxu1 %v1059_v9 }
 0x17d   :  { %v992_v16 = vadd.f32 %v1701_v57, %v895_v14  ;;  %v1635_v17 = vpop.f32.mrb[40].mxu0  ;;  %v1045_v20 = vmax.f32 %v989_v13, 0.0 }
 0x17e   :  { %v1636_v19 = vpop.f32.mrb[41].mxu0 }
 0x17f   :  { %v1046_v21 = vmax.f32 %v992_v16, 0.0  ;;  %v1637_v23 = vadd.f32 %v1636_v19, %v1635_v17  ;;  %v1638_v24 = vpop.f32.mrb[42].mxu0  ;;  %v1708_v27 = vpop.f32.mrb[40].mxu1 }
 0x180   :  { %v1639_v26 = vpop.f32.mrb[43].mxu0  ;;  %v1012_v30 = vpop.f32.mrb[41].mxu1 }
 0x181   :  { %v1060_v28 = vpack.c.bf16 %v1046_v21, %v1045_v20  ;;  %v1640_v29 = vadd.f32 %v1639_v26, %v1638_v24  ;;  %v900_v63 = vadd.f32 %v1637_v23, %v2012_v15  ;;  %v1709_v32 = vpop.f32.mrb[42].mxu1 }
 0x182   :  { %v1015_v36 = vpop.f32.mrb[43].mxu1 }
 0x183   :  { %v997_v33 = vadd.f32 %v996_v47, %v900_v63  ;;  %1731 = vmatmul.mubr.bf16.vlgmr.msra.gmra.mrb[48].mxu1 %v1060_v28  ;;  %v903_v2 = vadd.f32 %v1640_v29, %v2014_v18 }
 0x185   :  { %v1000_v37 = vadd.f32 %v999_v50, %v903_v2  ;;  %v1641_v38 = vpop.f32.mrb[44].mxu0  ;;  %v1047_v40 = vmax.f32 %v997_v33, 0.0 }
 0x186   :  { %v1642_v39 = vpop.f32.mrb[45].mxu0 }
 0x187   :  { %v1048_v42 = vmax.f32 %v1000_v37, 0.0  ;;  %v1643_v43 = vadd.f32 %v1642_v39, %v1641_v38  ;;  %v1644_v45 = vpop.f32.mrb[46].mxu0  ;;  %v2052_v48 = vpop.f32.mrb[44].mxu1 }
 0x188   :  { %v1645_v46 = vpop.f32.mrb[47].mxu0  ;;  %v1028_v54 = vpop.f32.mrb[45].mxu1 }
 0x189   :  { %v1061_v51 = vpack.c.bf16 %v1048_v42, %v1047_v40  ;;  %v908_v15 = vadd.f32 %v1643_v43, %v2018_v31  ;;  %v1646_v52 = vadd.f32 %v1645_v46, %v1644_v45  ;;  %v1713_v55 = vpop.f32.mrb[46].mxu1 }
 0x18a   :  { %v1031_v57 = vpop.f32.mrb[47].mxu1 }
 0x18b   :  { %v1005_v56 = vadd.f32 %v1704_v8, %v908_v15  ;;  %v911_v18 = vadd.f32 %v1646_v52, %v2020_v35  ;;  %1734 = vmatprep.mubr.bf16.mxu1 %v1061_v51 }
 0x18d   :  { %v1008_v58 = vadd.f32 %v1705_v12, %v911_v18  ;;  %v1647_v34 = vpop.f32.mrb[48].mxu0  ;;  %v1049_v60 = vmax.f32 %v1005_v56, 0.0  ;;  %v1391_v56 = vld [vmem:[%s2087_s4] ss:$0 sm:$0xff] }
 0x18e   :  { %v1648_v59 = vpop.f32.mrb[49].mxu0 }
 0x18f   :  { %v1050_v61 = vmax.f32 %v1008_v58, 0.0  ;;  %v1649_v62 = vadd.f32 %v1648_v59, %v1647_v34  ;;  %v1650_v0 = vpop.f32.mrb[50].mxu0 }
 0x190   :  { %v1651_v1 = vpop.f32.mrb[51].mxu0 }
 0x191   :  { %v1652_v3 = vadd.f32 %v1651_v1, %v1650_v0  ;;  %v916_v5 = vadd.f32 %v1649_v62, %v2024_v49  ;;  %v1062_v31 = vpack.c.bf16 %v1050_v61, %v1049_v60 }
 0x193   :  { %v1013_v6 = vadd.f32 %v1012_v30, %v916_v5  ;;  %1735 = vmatmul.mubr.bf16.gmra.mrb[52].mxu1 %v1062_v31  ;;  %v919_v8 = vadd.f32 %v1652_v3, %v2026_v53 }
 0x195   :  { %v1016_v9 = vadd.f32 %v1015_v36, %v919_v8  ;;  %v1653_v35 = vpop.f32.mrb[52].mxu0  ;;  %v1051_v11 = vmax.f32 %v1013_v6, 0.0 }
 0x196   :  { %v1654_v10 = vpop.f32.mrb[53].mxu0 }
 0x197   :  { %v1052_v47 = vmax.f32 %v1016_v9, 0.0  ;;  %v1655_v12 = vadd.f32 %v1654_v10, %v1653_v35  ;;  %v1656_v13 = vpop.f32.mrb[54].mxu0 }
 0x198   :  { %v1657_v14 = vpop.f32.mrb[55].mxu0 }
 0x199   :  { %v1063_v50 = vpack.c.bf16 %v1052_v47, %v1051_v11  ;;  %v924_v16 = vadd.f32 %v1655_v12, %v2030_v4  ;;  %v1658_v17 = vadd.f32 %v1657_v14, %v1656_v13 }
 0x19b   :  { %v1021_v19 = vadd.f32 %v1708_v27, %v924_v16  ;;  %v927_v49 = vadd.f32 %v1658_v17, %v2032_v7  ;;  %1738 = vmatprep.mubr.bf16.mxu1 %v1063_v50 }
 0x19d   :  { %v1024_v20 = vadd.f32 %v1709_v32, %v927_v49  ;;  %v1659_v21 = vpop.f32.mrb[56].mxu0  ;;  %v1053_v53 = vmax.f32 %v1021_v19, 0.0 }
 0x19e   :  { %v1660_v23 = vpop.f32.mrb[57].mxu0 }
 0x19f   :  { %v1054_v24 = vmax.f32 %v1024_v20, 0.0  ;;  %v1661_v26 = vadd.f32 %v1660_v23, %v1659_v21  ;;  %v1662_v28 = vpop.f32.mrb[58].mxu0 }
 0x1a0   :  { %v1663_v29 = vpop.f32.mrb[59].mxu0 }
 0x1a1   :  { %v1664_v63 = vadd.f32 %v1663_v29, %v1662_v28  ;;  %v932_v30 = vadd.f32 %v1661_v26, %v2036_v22  ;;  %v1064_v33 = vpack.c.bf16 %v1054_v24, %v1053_v53 }
 0x1a3   :  { %v1029_v2 = vadd.f32 %v1028_v54, %v932_v30  ;;  %1739 = vmatmul.mubr.bf16.gmra.mrb[56].mxu1 %v1064_v33  ;;  %v935_v4 = vadd.f32 %v1664_v63, %v2038_v25 }
 0x1a5   :  { %v1032_v27 = vadd.f32 %v1031_v57, %v935_v4  ;;  %v1665_v36 = vpop.f32.mrb[60].mxu0  ;;  %v1055_v37 = vmax.f32 %v1029_v2, 0.0 }
 0x1a6   :  { %v1666_v7 = vpop.f32.mrb[61].mxu0 }
 0x1a7   :  { %v1056_v32 = vmax.f32 %v1032_v27, 0.0  ;;  %v1667_v38 = vadd.f32 %v1666_v7, %v1665_v36  ;;  %v1668_v39 = vpop.f32.mrb[62].mxu0 }
 0x1a8   :  { %v1669_v40 = vpop.f32.mrb[63].mxu0 }
 0x1a9   :  { %v1065_v42 = vpack.c.bf16 %v1056_v32, %v1055_v37  ;;  %v940_v43 = vadd.f32 %v1667_v38, %v2042_v41  ;;  %v1670_v45 = vadd.f32 %v1669_v40, %v1668_v39 }
 0x1ab   :  { %v1037_v46 = vadd.f32 %v2052_v48, %v940_v43  ;;  %v943_v22 = vadd.f32 %v1670_v45, %v2044_v44  ;;  %1742 = vmatprep.mubr.bf16.mxu1 %v1065_v42 }
 0x1ad   :  { %v1040_v51 = vadd.f32 %v1713_v55, %v943_v22  ;;  %v1057_v15 = vmax.f32 %v1037_v46, 0.0 }
 0x1af   :  { %v1058_v25 = vmax.f32 %v1040_v51, 0.0 }
 0x1b1   :  { %v1066_v52 = vpack.c.bf16 %v1058_v25, %v1057_v15 }
 0x1b3   :  { %1743 = vmatmul.mubr.bf16.gmra.mrb[60].mxu1 %v1066_v52 }
 0x256   :  { %v1732_v54 = vpop.f32.mrb[48].mxu1 }
 0x257   :  { %v1172_v18 = vpop.f32.mrb[49].mxu1  ;;  %v1181_v58 = vadd.f32 %v1732_v54, %v1391_v56 }
 0x258   :  { %v1733_v57 = vpop.f32.mrb[50].mxu1  ;;  %v1173_v59 = vadd.f32 %v1391_v56, %v1172_v18 }
 0x259   :  { %v1184_v41 = vadd.f32 %v1733_v57, %v1391_v56  ;;  %v1175_v34 = vpop.f32.mrb[51].mxu1 }
 0x25a   :  { %v1176_v48 = vadd.f32 %v1391_v56, %v1175_v34 }
 0x25b   :  { %v1440_v60 = vpack.c.bf16 %v1184_v41, %v1181_v58 }
 0x25c   :  { %v1435_v44 = vpack.c.bf16 %v1176_v48, %v1173_v59 }
 0x25d   :  { %1472 = vst [vmem:[#allocation8 + $0x8] sm:$0xff] %v1440_v60  }
 0x25e   :  { %1436 = vst [vmem:[#allocation8] sm:$0xff] %v1435_v44  }
 0x266   :  { %v1736_v55 = vpop.f32.mrb[52].mxu1 }
 0x267   :  { %v1188_v61 = vpop.f32.mrb[53].mxu1  ;;  %v1197_v0 = vadd.f32 %v1736_v55, %v1391_v56 }
 0x268   :  { %v1737_v62 = vpop.f32.mrb[54].mxu1  ;;  %v1189_v5 = vadd.f32 %v1391_v56, %v1188_v61 }
 0x269   :  { %v1200_v1 = vadd.f32 %v1737_v62, %v1391_v56  ;;  %v1191_v3 = vpop.f32.mrb[55].mxu1 }
 0x26a   :  { %v1192_v31 = vadd.f32 %v1391_v56, %v1191_v3 }
 0x26b   :  { %v1450_v6 = vpack.c.bf16 %v1200_v1, %v1197_v0 }
 0x26c   :  { %v1445_v8 = vpack.c.bf16 %v1192_v31, %v1189_v5 }
 0x26d   :  { %1474 = vst [vmem:[#allocation8 + $0x18] sm:$0xff] %v1450_v6  }
 0x26e   :  { %1473 = vst [vmem:[#allocation8 + $0x10] sm:$0xff] %v1445_v8  }
 0x276   :  { %v1740_v9 = vpop.f32.mrb[56].mxu1 }
 0x277   :  { %v1204_v35 = vpop.f32.mrb[57].mxu1  ;;  %v1213_v11 = vadd.f32 %v1740_v9, %v1391_v56 }
 0x278   :  { %v1741_v10 = vpop.f32.mrb[58].mxu1  ;;  %v1205_v13 = vadd.f32 %v1391_v56, %v1204_v35 }
 0x279   :  { %v1216_v47 = vadd.f32 %v1741_v10, %v1391_v56  ;;  %v1207_v12 = vpop.f32.mrb[59].mxu1 }
 0x27a   :  { %v1208_v14 = vadd.f32 %v1391_v56, %v1207_v12 }
 0x27b   :  { %v1460_v50 = vpack.c.bf16 %v1216_v47, %v1213_v11 }
 0x27c   :  { %v1455_v16 = vpack.c.bf16 %v1208_v14, %v1205_v13 }
 0x27d   :  { %1476 = vst [vmem:[#allocation8 + $0x28] sm:$0xff] %v1460_v50  }
 0x27e   :  { %1475 = vst [vmem:[#allocation8 + $0x20] sm:$0xff] %v1455_v16  }
 0x286   :  { %v1744_v17 = vpop.f32.mrb[60].mxu1 }
 0x287   :  { %v1220_v19 = vpop.f32.mrb[61].mxu1  ;;  %v1229_v20 = vadd.f32 %v1744_v17, %v1391_v56 }
 0x288   :  { %v1745_v49 = vpop.f32.mrb[62].mxu1  ;;  %v1221_v53 = vadd.f32 %v1391_v56, %v1220_v19 }
 0x289   :  { %v1232_v21 = vadd.f32 %v1745_v49, %v1391_v56  ;;  %v1223_v23 = vpop.f32.mrb[63].mxu1 }
 0x28a   :  { %v1224_v24 = vadd.f32 %v1391_v56, %v1223_v23 }
 0x28b   :  { %v1470_v26 = vpack.c.bf16 %v1232_v21, %v1229_v20 }
 0x28c   :  { %v1465_v28 = vpack.c.bf16 %v1224_v24, %v1221_v53 }
 0x28d   :  { %1478 = vst [vmem:[#allocation8 + $0x38] sm:$0xff] %v1470_v26  }
 0x28e   :  { %1477 = vst [vmem:[#allocation8 + $0x30] sm:$0xff] %v1465_v28  }
 0x28f   :  { %1319 = vsyncadd [#allocation4], 960  ;;  %s1912_s4 = smov [#allocation8]  }
 0x290   :  { %s1320_s11 = sshll.u32 %s1912_s4, 4  ;;  %s1321_s11 = int_to_ptr.vmem [resolvable:$true] %s1320_s11 }
 0x291   :  { %s1877_s12 = scalar_lea.vmem %s1321_s11, 64  ;;  %s1881_s13 = scalar_lea.vmem %s1321_s11, 1024 }
 0x292   :  { %p1878_p10 = scmp.ne.s32.totalorder %s1321_s11, %s1877_s12  ;;  %p1882_p11 = scmp.lt.s32.totalorder %s1321_s11, %s1321_s11 }
 0x293   :  { %p1883_p12 = scmp.lt.s32.totalorder %s1881_s13, %s1877_s12 }
 0x295   :  { %p1884_p13 = por %p1883_p12, %p1882_p11 }
 0x297   :  { %p1885_p0 = pnand %p1884_p13, %p1878_p10 }
 0x299   :  { %1888 = shalt.err (!%p1885_p0)
}
 0x29a   :  { %s1889_s16 = scalar_lea.hbm %s2088_s5, 64 }
 0x29b   :  { %p1890_p1 = scmp.ne.s32.totalorder %s2088_s5, %s1889_s16  ;;  %p1893_p2 = scmp.lt.u32.totalorder %s1889_s16, %s2088_s5 }
 0x29d   :  { %p1895_p3 = pnand %p1893_p2, %p1890_p1 }
 0x29f   :  { %1898 = shalt.err (!%p1895_p3)
}
 0x2a0   :  { %1326 = dma.vmem_to_hbm [thread:$0]  %s1321_s11, 64, %s2088_s5, [#allocation4], %s1906_s28, %s1906_s28, %s1907_s29  }
 0x2a1   :  { %1903 = dma.done.wait [#allocation4], 1024  }
 0x2a2   :  { %1904 = vsyncadd [#allocation4], 4294966272 }
 0x2a3   :  { %1330 = vsyncpa [#allocation3], 1 }
 0x2a4   :  { %1331 = vsyncpa [#allocation6], 1 }
 0x2a5   :  { %1332 = vsyncpa [#allocation4], 1 }

</bundles_post_ra>
